<compile_context>
chip_gen: v6e
topology: v6e:2x2x1
jax: 0.10.0
libtpu: 0.0.40
codegen_flags: <defaults>
</compile_context>

<pallas_src>
import jax
import jax.numpy as jnp
from jax.experimental import pallas as pl
from jax.experimental.pallas import tpu as pltpu


def mlp_kernel(x_ref, w1_ref, b1_ref, w2_ref, b2_ref, w3_ref, b3_ref,
               w4_ref, b4_ref, o_ref):
    # fc1 + ReLU  (bf16 MXU matmul, fp32 accumulate / activation)
    x = x_ref[...].astype(jnp.bfloat16)
    h = jnp.dot(x, w1_ref[...], preferred_element_type=jnp.float32)
    h = jnp.maximum(h + b1_ref[...], 0.0)
    # fc2 + ReLU
    h = jnp.dot(h.astype(jnp.bfloat16), w2_ref[...],
                preferred_element_type=jnp.float32)
    h = jnp.maximum(h + b2_ref[...], 0.0)
    # fc3 + ReLU
    h = jnp.dot(h.astype(jnp.bfloat16), w3_ref[...],
                preferred_element_type=jnp.float32)
    h = jnp.maximum(h + b3_ref[...], 0.0)
    # TODO(synk): dropout(p=0.3366) is identity in eval mode; training-mode RNG
    # masking (pltpu.prng_random_bits) intentionally not implemented.
    # fc4 (out_features = 1): broadcast-multiply by the single weight column and
    # row-reduce on the VPU/XLU instead of wasting 127/128 MXU output lanes.
    out = jnp.sum(h * w4_ref[...], axis=-1, keepdims=True) + b4_ref[...]
    o_ref[...] = out


def _round_up(n, m):
    return ((n + m - 1) // m) * m


def mlp_forward(x, params, tile_b=512):
    """Fused MLP forward. x: [B, F] float32. params: dict of fp32 weights/biases."""
    B, F = x.shape

    # Weights for the MXU layers go in as bf16 (fp32 accumulation inside the dot);
    # the fc4 column + all biases stay fp32 (they feed VPU ops only).
    w1 = params["w1"].astype(jnp.bfloat16)
    w2 = params["w2"].astype(jnp.bfloat16)
    w3 = params["w3"].astype(jnp.bfloat16)
    b1, b2, b3 = params["b1"], params["b2"], params["b3"]
    w4_row = params["w4"].reshape(1, -1).astype(jnp.float32)   # [1, 64]
    b4 = params["b4"].reshape(1, 1).astype(jnp.float32)

    weight_bytes = (w1.size + w2.size + w3.size) * 2 + (w4_row.size + 256 + 128 + 64 + 1) * 4

    # Tile the batch. Don't over-provision for tiny batches; shrink if the
    # double-buffered x tile + fp32 intermediates would overshoot ~48 MiB
    # (v7x has only 64 MiB VMEM per TensorCore).
    tile_b = min(tile_b, _round_up(B, 8))

    def _tile_bytes(tb):
        return (2 * tb * F * 4                       # double-buffered x tile (fp32)
                + tb * (256 + 128 + 64) * 6          # fp32 + bf16 intermediates
                + 2 * tb * 4                         # double-buffered output tile
                + weight_bytes)

    while tile_b > 8 and _tile_bytes(tile_b) > 48 * 1024 * 1024:
        tile_b //= 2
    tile_b = max(8, _round_up(tile_b, 8))

    B_pad = _round_up(B, tile_b)
    if B_pad != B:
        x = jnp.pad(x, ((0, B_pad - B), (0, 0)))
    grid = (B_pad // tile_b,)

    vmem_limit = int(min(48 * 1024 * 1024, max(2 * _tile_bytes(tile_b), 4 * 1024 * 1024)))

    def const_spec(a):
        # Resident in VMEM: same block every grid step -> DMA'd once.
        return pl.BlockSpec(a.shape, lambda i: (0,) * a.ndim)

    out = pl.pallas_call(
        mlp_kernel,
        out_shape=jax.ShapeDtypeStruct((B_pad, 1), jnp.float32),
        grid=grid,
        in_specs=[
            pl.BlockSpec((tile_b, F), lambda i: (i, 0)),   # x: streamed per tile
            const_spec(w1), const_spec(b1),
            const_spec(w2), const_spec(b2),
            const_spec(w3), const_spec(b3),
            const_spec(w4_row), const_spec(b4),
        ],
        # (tile_b, 1) output -> masked 1-lane stores; irrelevant to the roofline.
        out_specs=pl.BlockSpec((tile_b, 1), lambda i: (i, 0)),
        compiler_params=pltpu.CompilerParams(
            dimension_semantics=("parallel",),     # v7x: shard batch tiles across 2 TCs
            vmem_limit_bytes=vmem_limit,
        ),
    )(x, w1, b1, w2, b2, w3, b3, w4_row, b4)

    return out[:B]


def init_params(key, input_size):
    """Deterministic parameter init (Kaiming-uniform-ish like nn.Linear)."""
    dims = [(input_size, 256), (256, 128), (128, 64), (64, 1)]
    params = {}
    for i, (fan_in, fan_out) in enumerate(dims, start=1):
        key, kw, kb = jax.random.split(key, 3)
        bound = 1.0 / jnp.sqrt(fan_in)
        params[f"w{i}"] = jax.random.uniform(
            kw, (fan_in, fan_out), jnp.float32, -bound, bound)
        # biases kept 2D [1, out] so they broadcast cleanly over the batch dim
        params[f"b{i}"] = jax.random.uniform(
            kb, (1, fan_out), jnp.float32, -bound, bound)
    return params


def reference_forward(x, params):
    h = jnp.maximum(x @ params["w1"] + params["b1"], 0.0)
    h = jnp.maximum(h @ params["w2"] + params["b2"], 0.0)
    h = jnp.maximum(h @ params["w3"] + params["b3"], 0.0)
    return h @ params["w4"] + params["b4"]


if __name__ == "__main__":
    INPUT_SIZE = 32   # small synthetic stand-in for the pickled input_size
    BATCH = 8

    key = jax.random.PRNGKey(0)
    key, kx = jax.random.split(key)
    x = jax.random.normal(kx, (BATCH, INPUT_SIZE), jnp.float32)
    params = init_params(key, INPUT_SIZE)

    out = jax.block_until_ready(mlp_forward(x, params))
    ref = reference_forward(x, params)
    assert out.shape == (BATCH, 1), out.shape
    # bf16 matmul inputs with fp32 accumulation -> compare to fp32 ref loosely
    assert jnp.allclose(out, ref, atol=5e-2, rtol=5e-2), \
        f"max err {jnp.max(jnp.abs(out - ref))}"

    # Second check: batch not divisible by the tile -> exercises multi-step grid,
    # padding, and the tail slice.
    key, kx2 = jax.random.split(key)
    x2 = jax.random.normal(kx2, (300, INPUT_SIZE), jnp.float32)
    out2 = jax.block_until_ready(mlp_forward(x2, params, tile_b=128))
    ref2 = reference_forward(x2, params)
    assert out2.shape == (300, 1), out2.shape
    assert jnp.allclose(out2, ref2, atol=5e-2, rtol=5e-2), \
        f"max err {jnp.max(jnp.abs(out2 - ref2))}"

    print("KERNEL_OK")
</pallas_src>

<mosaic_0001>
module attributes {stable_mosaic.version = 11 : i64} {
  func.func @mlp_kernel(%arg0: i32, %arg1: memref<8x32xf32, #tpu.memory_space<vmem>>, %arg2: memref<32x256xbf16, #tpu.memory_space<vmem>>, %arg3: memref<1x256xf32, #tpu.memory_space<vmem>>, %arg4: memref<256x128xbf16, #tpu.memory_space<vmem>>, %arg5: memref<1x128xf32, #tpu.memory_space<vmem>>, %arg6: memref<128x64xbf16, #tpu.memory_space<vmem>>, %arg7: memref<1x64xf32, #tpu.memory_space<vmem>>, %arg8: memref<1x64xf32, #tpu.memory_space<vmem>>, %arg9: memref<1x1xf32, #tpu.memory_space<vmem>>, %arg10: memref<8x1xf32, #tpu.memory_space<vmem>>) attributes {dimension_semantics = [#tpu.dimension_semantics<parallel>], iteration_bounds = array<i64: 1>, scalar_prefetch = 0 : i64, scratch_operands = 0 : i64, tpu.core_type = #tpu.core_type<tc>, window_params = [{transform_indices = @transform_0, window_bounds = array<i64: 8, 32>}, {pipeline_mode = #tpu.pipeline_mode<synchronous>, transform_indices = @transform_1, window_bounds = array<i64: 32, 256>}, {pipeline_mode = #tpu.pipeline_mode<synchronous>, transform_indices = @transform_2, window_bounds = array<i64: 1, 256>}, {pipeline_mode = #tpu.pipeline_mode<synchronous>, transform_indices = @transform_3, window_bounds = array<i64: 256, 128>}, {pipeline_mode = #tpu.pipeline_mode<synchronous>, transform_indices = @transform_4, window_bounds = array<i64: 1, 128>}, {pipeline_mode = #tpu.pipeline_mode<synchronous>, transform_indices = @transform_5, window_bounds = array<i64: 128, 64>}, {pipeline_mode = #tpu.pipeline_mode<synchronous>, transform_indices = @transform_6, window_bounds = array<i64: 1, 64>}, {pipeline_mode = #tpu.pipeline_mode<synchronous>, transform_indices = @transform_7, window_bounds = array<i64: 1, 64>}, {pipeline_mode = #tpu.pipeline_mode<synchronous>, transform_indices = @transform_8, window_bounds = array<i64: 1, 1>}, {transform_indices = @transform_9, window_bounds = array<i64: 8, 1>}]} {
    %c0 = arith.constant 0 : index
    %c0_0 = arith.constant 0 : index
    %0 = vector.load %arg1[%c0, %c0_0] : memref<8x32xf32, #tpu.memory_space<vmem>>, vector<8x32xf32>
    %1 = arith.truncf %0 : vector<8x32xf32> to vector<8x32xbf16>
    %c0_1 = arith.constant 0 : index
    %c0_2 = arith.constant 0 : index
    %2 = vector.load %arg2[%c0_1, %c0_2] : memref<32x256xbf16, #tpu.memory_space<vmem>>, vector<32x256xbf16>
    %cst = arith.constant dense<0.000000e+00> : vector<8x256xf32>
    %3 = tpu.matmul %1, %2, %cst {dimension_numbers = #tpu.dot_dimension_numbers<[1], [0], [0], [1], [0, 0, 1, 1], [], []>} : vector<8x32xbf16>, vector<32x256xbf16>, vector<8x256xf32> -> vector<8x256xf32>
    %c0_3 = arith.constant 0 : index
    %c0_4 = arith.constant 0 : index
    %4 = vector.load %arg3[%c0_3, %c0_4] : memref<1x256xf32, #tpu.memory_space<vmem>>, vector<1x256xf32>
    %5 = vector.broadcast %4 : vector<1x256xf32> to vector<8x256xf32>
    %6 = arith.addf %3, %5 : vector<8x256xf32>
    %cst_5 = arith.constant 0.000000e+00 : f32
    %7 = vector.broadcast %cst_5 : f32 to vector<8x256xf32>
    %8 = arith.maximumf %6, %7 : vector<8x256xf32>
    %9 = arith.truncf %8 : vector<8x256xf32> to vector<8x256xbf16>
    %c0_6 = arith.constant 0 : index
    %c0_7 = arith.constant 0 : index
    %10 = vector.load %arg4[%c0_6, %c0_7] : memref<256x128xbf16, #tpu.memory_space<vmem>>, vector<256x128xbf16>
    %cst_8 = arith.constant dense<0.000000e+00> : vector<8x128xf32>
    %11 = tpu.matmul %9, %10, %cst_8 {dimension_numbers = #tpu.dot_dimension_numbers<[1], [0], [0], [1], [0, 0, 1, 1], [], []>} : vector<8x256xbf16>, vector<256x128xbf16>, vector<8x128xf32> -> vector<8x128xf32>
    %c0_9 = arith.constant 0 : index
    %c0_10 = arith.constant 0 : index
    %12 = vector.load %arg5[%c0_9, %c0_10] : memref<1x128xf32, #tpu.memory_space<vmem>>, vector<1x128xf32>
    %13 = vector.broadcast %12 : vector<1x128xf32> to vector<8x128xf32>
    %14 = arith.addf %11, %13 : vector<8x128xf32>
    %cst_11 = arith.constant 0.000000e+00 : f32
    %15 = vector.broadcast %cst_11 : f32 to vector<8x128xf32>
    %16 = arith.maximumf %14, %15 : vector<8x128xf32>
    %17 = arith.truncf %16 : vector<8x128xf32> to vector<8x128xbf16>
    %c0_12 = arith.constant 0 : index
    %c0_13 = arith.constant 0 : index
    %18 = vector.load %arg6[%c0_12, %c0_13] : memref<128x64xbf16, #tpu.memory_space<vmem>>, vector<128x64xbf16>
    %cst_14 = arith.constant dense<0.000000e+00> : vector<8x64xf32>
    %19 = tpu.matmul %17, %18, %cst_14 {dimension_numbers = #tpu.dot_dimension_numbers<[1], [0], [0], [1], [0, 0, 1, 1], [], []>} : vector<8x128xbf16>, vector<128x64xbf16>, vector<8x64xf32> -> vector<8x64xf32>
    %c0_15 = arith.constant 0 : index
    %c0_16 = arith.constant 0 : index
    %20 = vector.load %arg7[%c0_15, %c0_16] : memref<1x64xf32, #tpu.memory_space<vmem>>, vector<1x64xf32>
    %21 = vector.broadcast %20 : vector<1x64xf32> to vector<8x64xf32>
    %22 = arith.addf %19, %21 : vector<8x64xf32>
    %cst_17 = arith.constant 0.000000e+00 : f32
    %23 = vector.broadcast %cst_17 : f32 to vector<8x64xf32>
    %24 = arith.maximumf %22, %23 : vector<8x64xf32>
    %c0_18 = arith.constant 0 : index
    %c0_19 = arith.constant 0 : index
    %25 = vector.load %arg8[%c0_18, %c0_19] : memref<1x64xf32, #tpu.memory_space<vmem>>, vector<1x64xf32>
    %26 = vector.broadcast %25 : vector<1x64xf32> to vector<8x64xf32>
    %27 = arith.mulf %24, %26 : vector<8x64xf32>
    %cst_20 = arith.constant dense<0.000000e+00> : vector<8xf32>
    %28 = vector.multi_reduction <add>, %27, %cst_20 [1] : vector<8x64xf32> to vector<8xf32>
    %29 = vector.shape_cast %28 : vector<8xf32> to vector<8x1xf32>
    %c0_21 = arith.constant 0 : index
    %c0_22 = arith.constant 0 : index
    %30 = vector.load %arg9[%c0_21, %c0_22] : memref<1x1xf32, #tpu.memory_space<vmem>>, vector<1x1xf32>
    %31 = vector.broadcast %30 : vector<1x1xf32> to vector<8x1xf32>
    %32 = arith.addf %29, %31 : vector<8x1xf32>
    %c0_23 = arith.constant 0 : index
    %c0_24 = arith.constant 0 : index
    %33 = vector.load %arg10[%c0_23, %c0_24] : memref<8x1xf32, #tpu.memory_space<vmem>>, vector<8x1xf32>
    tpu.vector_store %arg10[%c0_23, %c0_24], %32 {strides = array<i32>} : memref<8x1xf32, #tpu.memory_space<vmem>>, vector<8x1xf32>,
    return
  }
  func.func @transform_0(%arg0: i32) -> (i32, i32) {
    %c0_i32 = arith.constant 0 : i32
    %c0_i32_0 = arith.constant 0 : i32
    return %arg0, %c0_i32 : i32, i32
  }
  func.func @transform_1(%arg0: i32) -> (i32, i32) {
    %c0_i32 = arith.constant 0 : i32
    %c0_i32_0 = arith.constant 0 : i32
    %c0_i32_1 = arith.constant 0 : i32
    return %c0_i32, %c0_i32_0 : i32, i32
  }
  func.func @transform_2(%arg0: i32) -> (i32, i32) {
    %c0_i32 = arith.constant 0 : i32
    %c0_i32_0 = arith.constant 0 : i32
    %c0_i32_1 = arith.constant 0 : i32
    return %c0_i32, %c0_i32_0 : i32, i32
  }
  func.func @transform_3(%arg0: i32) -> (i32, i32) {
    %c0_i32 = arith.constant 0 : i32
    %c0_i32_0 = arith.constant 0 : i32
    %c0_i32_1 = arith.constant 0 : i32
    return %c0_i32, %c0_i32_0 : i32, i32
  }
  func.func @transform_4(%arg0: i32) -> (i32, i32) {
    %c0_i32 = arith.constant 0 : i32
    %c0_i32_0 = arith.constant 0 : i32
    %c0_i32_1 = arith.constant 0 : i32
    return %c0_i32, %c0_i32_0 : i32, i32
  }
  func.func @transform_5(%arg0: i32) -> (i32, i32) {
    %c0_i32 = arith.constant 0 : i32
    %c0_i32_0 = arith.constant 0 : i32
    %c0_i32_1 = arith.constant 0 : i32
    return %c0_i32, %c0_i32_0 : i32, i32
  }
  func.func @transform_6(%arg0: i32) -> (i32, i32) {
    %c0_i32 = arith.constant 0 : i32
    %c0_i32_0 = arith.constant 0 : i32
    %c0_i32_1 = arith.constant 0 : i32
    return %c0_i32, %c0_i32_0 : i32, i32
  }
  func.func @transform_7(%arg0: i32) -> (i32, i32) {
    %c0_i32 = arith.constant 0 : i32
    %c0_i32_0 = arith.constant 0 : i32
    %c0_i32_1 = arith.constant 0 : i32
    return %c0_i32, %c0_i32_0 : i32, i32
  }
  func.func @transform_8(%arg0: i32) -> (i32, i32) {
    %c0_i32 = arith.constant 0 : i32
    %c0_i32_0 = arith.constant 0 : i32
    %c0_i32_1 = arith.constant 0 : i32
    return %c0_i32, %c0_i32_0 : i32, i32
  }
  func.func @transform_9(%arg0: i32) -> (i32, i32) {
    %c0_i32 = arith.constant 0 : i32
    %c0_i32_0 = arith.constant 0 : i32
    return %arg0, %c0_i32 : i32, i32
  }
}

</mosaic_0001>

<bundles_post_ra>
// kernel: tpu_custom_call.1
= control target key start
LH: loop header
LB: loop body
LE: loop exit
PB: predicated region body
PF: predicated region fallthrough
CT: control target
= control target key end

     0   :  { %s710_s0 = inlined_call_operand.vmem [shape: f32[8,32], index: 0, kind: input, shape index: {}]   ;;  %s711_s1 = inlined_call_operand.vmem [shape: bf16[32,256], index: 1, kind: input, shape index: {}]   ;;  %s712_s2 = inlined_call_operand.vmem [shape: f32[1,256], index: 2, kind: input, shape index: {}]   ;;  %s713_s3 = inlined_call_operand.hbm [shape: bf16[256,128], index: 3, kind: input, shape index: {}]   ;;  %s714_s4 = inlined_call_operand.vmem [shape: f32[1,128], index: 4, kind: input, shape index: {}]   ;;  %s715_s5 = inlined_call_operand.vmem [shape: bf16[128,64], index: 5, kind: input, shape index: {}]   ;;  %s716_s6 = inlined_call_operand.vmem [shape: f32[1,64], index: 6, kind: input, shape index: {}]   ;;  %s717_s7 = inlined_call_operand.vmem [shape: f32[1,64], index: 7, kind: input, shape index: {}]   ;;  %s718_s8 = inlined_call_operand.<no memory space> [shape: f32[1,1], index: 8, kind: input, shape index: {}]   ;;  %s719_s9 = inlined_call_operand.vmem [shape: f32[8,1], index: 9, kind: output, shape index: {}]  }
   0x1   :  { %v14_v0 = vstv %s718_s8 }
   0x2   :  { %15 = vst [vmem:[#allocation2] sm:$0x1] %v14_v0 }
   0x3   :  { %16 = vsyncpa [#allocation4], 0  ;;  %s594_s11 = smov [#allocation3]  }
   0x4   :  { %s28_s12 = sshll.u32 %s594_s11, 4  ;;  %s29_s12 = int_to_ptr.vmem [resolvable:$true] %s28_s12 }
   0x5   :  { %s580_s13 = scalar_lea.vmem %s29_s12, 2048  ;;  %p585_p1 = scmp.lt.s32.totalorder %s29_s12, %s29_s12 }
   0x6   :  { %p581_p0 = scmp.ne.s32.totalorder %s29_s12, %s580_s13  ;;  %p586_p2 = scmp.lt.s32.totalorder %s580_s13, %s580_s13 }
   0x8   :  { %p587_p3 = por %p586_p2, %p585_p1 }
   0xa   :  { %p588_p4 = pnand %p587_p3, %p581_p0 }
   0xc   :  { %591 = shalt.err (!%p588_p4)
}
   0xd   :  { %s595_s14 = smov 64   ;;  %s596_s15 = smov 4  }
   0xe   :  { %34 = dma.hbm_to_vmem [thread:$0]  %s713_s3, 2048, %s29_s12, [#allocation4], %s595_s14, %s595_s14, %s596_s15  }
   0xf   :  { %592 = dma.done.wait [#allocation4], 2048  }
  0x10   :  { %593 = vsyncadd [#allocation4], 4294965248  ;;  %v597_v1 = vmov 0   ;;  %v542_v2 = vld [vmem:[%s711_s1 + $0x14] ss:$8 sps:$4 sm:$0xff]   ;;  %v49_v6 = vld [vmem:[%s710_s0] sm:$0xff]  ;;  %v57_v30 = vlaneseq }
  0x11   :  { %123 = vmatprep.mubr.bf16.mxu0 %v597_v1  ;;  %v544_v3 = vld [vmem:[%s711_s1 + $0x10] ss:$8 sps:$4 sm:$0xff]   ;;  %103 = vmatprep.subr.bf16.mxu0 %v542_v2  ;;  %v545_v4 = vld [vmem:[%s711_s1 + $0x4] ss:$8 sps:$4 sm:$0xff]   ;;  %v547_v5 = vld [vmem:[%s711_s1] ss:$8 sps:$4 sm:$0xff]   ;;  %v50_v10 = vpack.c.bf16 %v49_v6, %v49_v6 }
  0x12   :  { %104 = vmatpush1.bf16.msra.mxu0 %v544_v3  ;;  %v548_v7 = vld [vmem:[#allocation3 + $0x78] sm:$0xff]   ;;  %v550_v9 = vld [vmem:[#allocation3 + $0x70] sm:$0xff]   ;;  %vm87_vm0 = vcmask 261120   ;;  %v552_v12 = vld [vmem:[#allocation3 + $0x68] sm:$0xff]   ;;  %v598_v25 = vmov 0.0   ;;  %v58_v31 = vshrl.u32 %v57_v30, 7 }
  0x13   :  { %105 = vmatprep.subr.bf16.mxu0 %v545_v4  ;;  %v549_v8 = vld [vmem:[#allocation3 + $0x38] sm:$0xff]   ;;  %485 = vmatprep.subr.bf16.mxu1 %v548_v7  ;;  %v551_v11 = vld [vmem:[#allocation3 + $0x30] sm:$0xff]   ;;  %v553_v13 = vld [vmem:[#allocation3 + $0x28] sm:$0xff]   ;;  %vm599_vm1 = vmmov 0   ;;  %vm433_vm2 = vcmask 523264   ;;  %vm445_vm3 = vcmask 7168  }
  0x14   :  { %486 = vmatpush3.bf16.msra.mxu1 %v549_v8  ;;  %v554_v14 = vld [vmem:[#allocation3 + $0x60] sm:$0xff]   ;;  %v556_v16 = vld [vmem:[#allocation3 + $0x58] sm:$0xff]   ;;  %v558_v18 = vld [vmem:[#allocation3 + $0x50] sm:$0xff]   ;;  %v59_v32 = vsub.s32 0, %v58_v31  ;;  %v63_v34 = vsub.s32 1, %v58_v31 }
  0x15   :  { %487 = vmatprep.subr.bf16.mxu1 %v550_v9  ;;  %v555_v15 = vld [vmem:[#allocation3 + $0x20] sm:$0xff]   ;;  %v557_v17 = vld [vmem:[#allocation3 + $0x18] sm:$0xff]   ;;  %v559_v19 = vld [vmem:[#allocation3 + $0x10] sm:$0xff]  }
  0x16   :  { %106 = vmatpush1.bf16.msra.mxu0 %v547_v5  ;;  %v560_v20 = vld [vmem:[#allocation3 + $0x48] sm:$0xff]   ;;  %v562_v22 = vld [vmem:[#allocation3 + $0x40] sm:$0xff]   ;;  %v564_v24 = vld [vmem:[%s715_s5 + $0x38] sm:$0xff]  }
  0x17   :  { %v561_v21 = vld [vmem:[#allocation3 + $0x8] sm:$0xff]   ;;  %v563_v23 = vld [vmem:[#allocation3] sm:$0xff]   ;;  %516 = vmatprep.subr.bf16.mxu0 %v598_v25  ;;  %v568_v29 = vld [vmem:[%s715_s5 + $0x18] sm:$0xff]  }
  0x18   :  { %488 = vmatpush3.bf16.msra.mxu1 %v551_v11  ;;  %v565_v26 = vld [vmem:[%s715_s5 + $0x30] sm:$0xff]   ;;  %v566_v27 = vld [vmem:[%s715_s5 + $0x28] sm:$0xff]   ;;  %v567_v28 = vld [vmem:[%s715_s5 + $0x20] sm:$0xff]  }
  0x19   :  { %456 = vmatmul.mubr.msk.bf16.vlgmr.msra.gmra.mxu0 %vm87_vm0, %v50_v10  ;;  %489 = vmatprep.subr.bf16.mxu1 %v552_v12  ;;  %v55_v33 = vld [vmem:[%s712_s2] sm:$0x3]  ;;  %v569_v47 = vld [vmem:[%s715_s5 + $0x10] sm:$0xff]   ;;  %v570_v48 = vld [vmem:[%s715_s5 + $0x8] sm:$0xff]  }
  0x1a   :  { %517 = vmatpush3.bf16.msra.mxu0 %v564_v24  ;;  %v60_v35 = vrot.slane %v55_v33, %v59_v32  ;;  %v64_v36 = vrot.slane %v55_v33, %v63_v34  ;;  %v571_v49 = vld [vmem:[%s715_s5] sm:$0xff]   ;;  %532 = vmatprep.mubr.msk.bf16.mxu0 %vm599_vm1, %v598_v25 }
  0x1b   :  { %518 = vmatprep.subr.bf16.mxu0 %v598_v25  ;;  %v457_v51 = vld [vmem:[%s714_s4] ss:$0 sm:$0xff] }
  0x1c   :  { %490 = vmatpush3.bf16.msra.mxu1 %v553_v13  ;;  %v474_v59 = vld [vmem:[%s716_s6] ss:$0 sm:$0xff] }
  0x1d   :  { %491 = vmatprep.subr.bf16.mxu1 %v554_v14  ;;  %v483_v63 = vld [vmem:[%s717_s7] ss:$0 sm:$0xff] }
  0x1e   :  { %519 = vmatpush3.bf16.msra.mxu0 %v565_v26  ;;  %v484_v5 = vld [vmem:[#allocation2] ss:$0 sm:$0xff] }
  0x1f   :  { %520 = vmatprep.subr.bf16.mxu0 %v598_v25 }
  0x20   :  { %492 = vmatpush3.bf16.msra.mxu1 %v555_v15 }
  0x21   :  { %493 = vmatprep.subr.bf16.mxu1 %v556_v16 }
  0x22   :  { %521 = vmatpush3.bf16.msra.mxu0 %v566_v27 }
  0x23   :  { %522 = vmatprep.subr.bf16.mxu0 %v598_v25 }
  0x24   :  { %494 = vmatpush3.bf16.msra.mxu1 %v557_v17 }
  0x25   :  { %495 = vmatprep.subr.bf16.mxu1 %v558_v18 }
  0x26   :  { %523 = vmatpush3.bf16.msra.mxu0 %v567_v28 }
  0x27   :  { %524 = vmatprep.subr.bf16.mxu0 %v598_v25 }
  0x28   :  { %496 = vmatpush3.bf16.msra.mxu1 %v559_v19 }
  0x29   :  { %497 = vmatprep.subr.bf16.mxu1 %v560_v20 }
  0x2a   :  { %525 = vmatpush3.bf16.msra.mxu0 %v568_v29 }
  0x2b   :  { %526 = vmatprep.subr.bf16.mxu0 %v598_v25 }
  0x2c   :  { %498 = vmatpush3.bf16.msra.mxu1 %v561_v21 }
  0x2d   :  { %499 = vmatprep.subr.bf16.mxu1 %v562_v22 }
  0x2e   :  { %527 = vmatpush3.bf16.msra.mxu0 %v569_v47 }
  0x2f   :  { %528 = vmatprep.subr.bf16.mxu0 %v598_v25 }
  0x30   :  { %500 = vmatpush3.bf16.msra.mxu1 %v563_v23 }
  0x32   :  { %529 = vmatpush3.bf16.msra.mxu0 %v570_v48 }
  0x33   :  { %530 = vmatprep.subr.bf16.mxu0 %v598_v25 }
  0x36   :  { %531 = vmatpush3.bf16.msra.mxu0 %v571_v49 }
  0xd9   :  { %v125_v37 = vpop.f32.mrf.mxu0 }
  0xda   :  { %v126_v38 = vadd.f32 %v125_v37, %v60_v35 }
  0xdb   :  { %v127_v39 = vpop.f32.mrf.mxu0 }
  0xdc   :  { %v128_v40 = vadd.f32 %v127_v39, %v64_v36  ;;  %v132_v41 = vmax.f32 %v126_v38, 0.0 }
  0xdd   :  { %v129_v42 = vpop.f32.mrf.mxu0 }
  0xde   :  { %v133_v43 = vmax.f32 %v128_v40, 0.0  ;;  %v134_v46 = vpack.c.bf16 %v132_v41, %v132_v41 }
  0xdf   :  { %v130_v44 = vpop.f32.mrf.mxu0 }
  0xe0   :  { %v135_v45 = vpack.c.bf16 %v133_v43, %v133_v43 }
  0xe2   :  { %303 = vmatprep.mubr.bf16.mxu1 %v135_v45 }
  0xe3   :  { %304 = vmatmul.mubr.bf16.vlgmr.msra.gmra.mxu1 %v134_v46 }
 0x1a3   :  { %v501_v50 = vpop.f32.mrf.mxu1 }
 0x1a5   :  { %v502_v52 = vpop.f32.mrf.mxu1 }
 0x1a6   :  { %v503_v53 = vadd.f32 %v502_v52, %v501_v50 }
 0x1a7   :  { %v504_v54 = vpop.f32.mrf.mxu1 }
 0x1a8   :  { %v306_v55 = vadd.f32 %v503_v53, %v457_v51 }
 0x1a9   :  { %v505_v56 = vpop.f32.mrf.mxu1 }
 0x1aa   :  { %v311_v57 = vmax.f32 %v306_v55, 0.0 }
 0x1ac   :  { %v312_v58 = vpack.c.bf16 %v311_v57, %v311_v57 }
 0x1ae   :  { %533 = vmatmul.mubr.bf16.vlgmr.msra.gmra.mxu0 %v312_v58 }
 0x26e   :  { %v418_v60 = vpop.f32.mrf.mxu0 }
 0x26f   :  { %v419_v61 = vadd.f32 %v474_v59, %v418_v60 }
 0x270   :  { %v534_v62 = vpop.f32.mrf.mxu0 }
 0x271   :  { %v424_v0 = vmax.f32 %v419_v61, 0.0 }
 0x272   :  { %v421_v1 = vpop.f32.mrf.mxu0 }
 0x273   :  { %v432_v2 = vmul.f32 %v483_v63, %v424_v0 }
 0x274   :  { %v535_v3 = vpop.f32.mrf.mxu0 }
 0x275   :  { %v434_v4 = vsel %vm433_vm2, %v432_v2, 0.0 }
 0x276   :  { %435 = vadd.xlane.f32.xlu0 %v434_v4 }
 0x2ff   :  { %v436_v6 = vpop.xlane.xlu0 %435 }
 0x300   :  { %v444_v7 = vadd.f32 %v484_v5, %v436_v6 }
 0x302   :  { %446 = vst.msk [vmem:[%s719_s9] sm:$0xff] %vm445_vm3, %v444_v7 }
 0x303   :  { %451 = vsyncpa [#allocation4], 1 }

</bundles_post_ra>
